<compile_context>
chip_gen: v7x
topology: tpu7x:2x2x1
jax: 0.10.0
libtpu: 0.0.40
codegen_flags: <defaults>
</compile_context>

<pallas_src>
import jax
import jax.numpy as jnp
from jax.experimental import pallas as pl
from jax.experimental.pallas import tpu as pltpu


def _msle_partial_kernel(x_ref, y_ref, out_ref):
    # x_ref / y_ref: (TM, 128) tiles in VMEM (native dtype).
    # out_ref: (1, 8, 128) f32 per-block partial-sum output.
    xf = x_ref[...].astype(jnp.float32)
    yf = y_ref[...].astype(jnp.float32)
    d = jnp.log1p(xf) - jnp.log1p(yf)
    sq = d * d
    tm, lanes = sq.shape
    # Fold the row axis in vreg-sized (8, 128) chunks -> pure VPU adds,
    # no per-step cross-lane (XLU) reduce, no scalar RMW.
    partial = jnp.sum(sq.reshape(tm // 8, 8, lanes), axis=0)  # (8, 128) f32
    out_ref[...] = partial[None, :, :]


def _round_up(a: int, b: int) -> int:
    return -(-a // b) * b


def msle_loss(x: jax.Array, y: jax.Array) -> jax.Array:
    assert x.shape == y.shape
    n = x.size
    lanes = 128
    tm_max = 2048  # 2048 x 128 f32 = 1 MiB per input per pipeline buffer

    rows = -(-n // lanes)                 # ceil(n / 128)
    tm = min(tm_max, _round_up(rows, 8))  # (8,128)-aligned row tile
    rows_pad = _round_up(rows, tm)
    n_pad = rows_pad * lanes

    xf = x.reshape(-1)
    yf = y.reshape(-1)
    if n_pad != n:
        # Zero padding: log1p(0) - log1p(0) == 0, contributes nothing.
        xf = jnp.pad(xf, (0, n_pad - n))
        yf = jnp.pad(yf, (0, n_pad - n))

    x2 = xf.reshape(rows_pad, lanes)  # native dtype; upcast happens in-kernel
    y2 = yf.reshape(rows_pad, lanes)

    num_blocks = rows_pad // tm

    partials = pl.pallas_call(
        _msle_partial_kernel,
        out_shape=jax.ShapeDtypeStruct((num_blocks, 8, lanes), jnp.float32),
        grid_spec=pltpu.PrefetchScalarGridSpec(
            num_scalar_prefetch=0,
            grid=(num_blocks,),
            in_specs=[
                pl.BlockSpec((tm, lanes), lambda i: (i, 0)),
                pl.BlockSpec((tm, lanes), lambda i: (i, 0)),
            ],
            out_specs=pl.BlockSpec((1, 8, lanes), lambda i: (i, 0, 0)),
        ),
        compiler_params=pltpu.CompilerParams(
            dimension_semantics=("parallel",),
        ),
    )(x2, y2)

    # Single cross-block/cross-lane reduce + mean over the TRUE element count.
    return jnp.sum(partials) / jnp.float32(n)


if __name__ == "__main__":
    key = jax.random.PRNGKey(0)
    k1, k2 = jax.random.split(key)
    # NCHW inputs, non-negative so log1p is well defined (typical MSLE use).
    x = jax.random.uniform(k1, (2, 4, 16, 16), dtype=jnp.float32) * 5.0
    y = jax.random.uniform(k2, (2, 4, 16, 16), dtype=jnp.float32) * 5.0

    loss = msle_loss(x, y)
    jax.block_until_ready(loss)

    ref = jnp.mean((jnp.log1p(x) - jnp.log1p(y)) ** 2)
    assert jnp.allclose(loss, ref, rtol=1e-5, atol=1e-6), (loss, ref)
    print("KERNEL_OK")
</pallas_src>

<mosaic_0001>
module attributes {stable_mosaic.version = 11 : i64} {
  func.func @_msle_partial_kernel(%arg0: i32, %arg1: memref<16x128xf32, #tpu.memory_space<vmem>>, %arg2: memref<16x128xf32, #tpu.memory_space<vmem>>, %arg3: memref<1x8x128xf32, #tpu.memory_space<vmem>>) attributes {dimension_semantics = [#tpu.dimension_semantics<parallel>], iteration_bounds = array<i64: 1>, scalar_prefetch = 0 : i64, scratch_operands = 0 : i64, tpu.core_type = #tpu.core_type<tc>, window_params = [{transform_indices = @transform_0, window_bounds = array<i64: 16, 128>}, {transform_indices = @transform_1, window_bounds = array<i64: 16, 128>}, {transform_indices = @transform_2, window_bounds = array<i64: 1, 8, 128>}]} {
    %c0 = arith.constant 0 : index
    %c0_0 = arith.constant 0 : index
    %0 = vector.load %arg1[%c0, %c0_0] : memref<16x128xf32, #tpu.memory_space<vmem>>, vector<16x128xf32>
    %c0_1 = arith.constant 0 : index
    %c0_2 = arith.constant 0 : index
    %1 = vector.load %arg2[%c0_1, %c0_2] : memref<16x128xf32, #tpu.memory_space<vmem>>, vector<16x128xf32>
    %2 = math.log1p %0 : vector<16x128xf32>
    %3 = math.log1p %1 : vector<16x128xf32>
    %4 = arith.subf %2, %3 : vector<16x128xf32>
    %5 = arith.mulf %4, %4 : vector<16x128xf32>
    %6 = vector.shape_cast %5 : vector<16x128xf32> to vector<2x8x128xf32>
    %cst = arith.constant dense<0.000000e+00> : vector<8x128xf32>
    %7 = vector.multi_reduction <add>, %6, %cst [0] : vector<2x8x128xf32> to vector<8x128xf32>
    %8 = vector.shape_cast %7 : vector<8x128xf32> to vector<1x8x128xf32>
    %c0_3 = arith.constant 0 : index
    %c0_4 = arith.constant 0 : index
    %c0_5 = arith.constant 0 : index
    %9 = vector.load %arg3[%c0_3, %c0_4, %c0_5] : memref<1x8x128xf32, #tpu.memory_space<vmem>>, vector<1x8x128xf32>
    tpu.vector_store %arg3[%c0_3, %c0_4, %c0_5], %8 {strides = array<i32>} : memref<1x8x128xf32, #tpu.memory_space<vmem>>, vector<1x8x128xf32>,
    return
  }
  func.func @transform_0(%arg0: i32) -> (i32, i32) {
    %c0_i32 = arith.constant 0 : i32
    %c0_i32_0 = arith.constant 0 : i32
    return %arg0, %c0_i32 : i32, i32
  }
  func.func @transform_1(%arg0: i32) -> (i32, i32) {
    %c0_i32 = arith.constant 0 : i32
    %c0_i32_0 = arith.constant 0 : i32
    return %arg0, %c0_i32 : i32, i32
  }
  func.func @transform_2(%arg0: i32) -> (i32, i32, i32) {
    %c0_i32 = arith.constant 0 : i32
    %c0_i32_0 = arith.constant 0 : i32
    %c0_i32_1 = arith.constant 0 : i32
    return %arg0, %c0_i32, %c0_i32_0 : i32, i32, i32
  }
}

</mosaic_0001>

<bundles_post_ra>
// kernel: tpu_custom_call.1
= control target key start
LH: loop header
LB: loop body
LE: loop exit
PB: predicated region body
PF: predicated region fallthrough
CT: control target
= control target key end

     0   :  { %7 = vsyncpa [#allocation3], 0  ;;  %s249_s0 = inlined_call_operand.hbm [shape: f32[16,128], index: 0, kind: input, shape index: {}]   ;;  %s250_s1 = inlined_call_operand.hbm [shape: f32[16,128], index: 1, kind: input, shape index: {}]   ;;  %s251_s2 = inlined_call_operand.hbm [shape: f32[1,8,128], index: 2, kind: output, shape index: {}]  }
   0x1   :  { %8 = vsyncpa [#allocation6], 0 }
   0x2   :  { %9 = vsyncpa [#allocation4], 0  ;;  %s187_s9 = smov [#allocation2]   ;;  %s115_s13 = scalar_lea.hbm %s249_s0, 256 }
   0x3   :  { %s15_s10 = sshll.u32 %s187_s9, 4  ;;  %p116_p0 = scmp.ne.s32.totalorder %s249_s0, %s115_s13  ;;  %s16_s10 = int_to_ptr.vmem [resolvable:$true] %s15_s10 }
   0x4   :  { %p119_p1 = scmp.lt.u32.totalorder %s115_s13, %s249_s0 }
   0x6   :  { %p121_p2 = pnand %p119_p1, %p116_p0 }
   0x8   :  { %124 = shalt.err (!%p121_p2)
}
   0x9   :  { %s125_s18 = scalar_lea.vmem %s16_s10, 256  ;;  %p130_p4 = scmp.lt.s32.totalorder %s16_s10, %s16_s10 }
   0xa   :  { %p126_p3 = scmp.ne.s32.totalorder %s16_s10, %s125_s18  ;;  %p131_p5 = scmp.lt.s32.totalorder %s125_s18, %s125_s18 }
   0xc   :  { %p132_p6 = por %p131_p5, %p130_p4 }
   0xe   :  { %p133_p7 = pnand %p132_p6, %p126_p3 }
  0x10   :  { %136 = shalt.err (!%p133_p7)
}
  0x11   :  { %s188_s19 = smov 128   ;;  %s189_s20 = smov 8  }
  0x12   :  { %21 = dma.hbm_to_vmem [thread:$0]  %s249_s0, 256, %s16_s10, [#allocation3], %s188_s19, %s188_s19, %s189_s20  }
  0x13   :  { %s190_s23 = smov [#allocation5]   ;;  %s137_s27 = scalar_lea.hbm %s250_s1, 256 }
  0x14   :  { %s27_s24 = sshll.u32 %s190_s23, 4  ;;  %p138_p8 = scmp.ne.s32.totalorder %s250_s1, %s137_s27  ;;  %s28_s24 = int_to_ptr.vmem [resolvable:$true] %s27_s24 }
  0x15   :  { %p141_p9 = scmp.lt.u32.totalorder %s137_s27, %s250_s1 }
  0x17   :  { %p143_p10 = pnand %p141_p9, %p138_p8 }
  0x19   :  { %146 = shalt.err (!%p143_p10)
}
  0x1a   :  { %s147_s4 = scalar_lea.vmem %s28_s24, 256  ;;  %p152_p12 = scmp.lt.s32.totalorder %s28_s24, %s28_s24 }
  0x1b   :  { %p148_p11 = scmp.ne.s32.totalorder %s28_s24, %s147_s4  ;;  %p153_p13 = scmp.lt.s32.totalorder %s147_s4, %s147_s4 }
  0x1d   :  { %p154_p0 = por %p153_p13, %p152_p12 }
  0x1f   :  { %p155_p1 = pnand %p154_p0, %p148_p11 }
  0x21   :  { %158 = shalt.err (!%p155_p1)
}
  0x22   :  { %33 = dma.hbm_to_vmem [thread:$0]  %s250_s1, 256, %s28_s24, [#allocation6], %s188_s19, %s188_s19, %s189_s20  }
  0x23   :  { %181 = dma.done.wait [#allocation3], 256  }
  0x24   :  { %182 = vsyncadd [#allocation3], 4294967040 }
  0x25   :  { %183 = dma.done.wait [#allocation6], 256  }
  0x26   :  { %184 = vsyncadd [#allocation6], 4294967040  ;;  %v40_v0 = vld [vmem:[#allocation2] sm:$0xff]  ;;  %v41_v1 = vld [vmem:[#allocation2 + $0x8] sm:$0xff]  ;;  %s191_s1 = smov [#allocation7]  }
  0x27   :  { %v42_v2 = vld [vmem:[#allocation5] sm:$0xff]  ;;  %v44_v3 = vadd.f32 1.0, %v40_v0  ;;  %v53_v4 = vadd.f32 1.0, %v41_v1  ;;  %v43_v5 = vld [vmem:[#allocation5 + $0x8] sm:$0xff]  ;;  %v47_v7 = vmul.f32 -0.5, %v40_v0  ;;  %v56_v9 = vmul.f32 -0.5, %v41_v1 }
  0x28   :  { %v62_v6 = vadd.f32 1.0, %v42_v2  ;;  %v71_v8 = vadd.f32 1.0, %v43_v5  ;;  %v65_v10 = vmul.f32 -0.5, %v42_v2  ;;  %v74_v12 = vmul.f32 -0.5, %v43_v5  ;;  %s92_s6 = sshll.u32 %s191_s1, 4  ;;  %s93_s6 = int_to_ptr.vmem [resolvable:$true] %s92_s6 }
  0x29   :  { %107 = vlog2.f32 %v44_v3  ;;  %v48_v11 = vadd.f32 1.0, %v47_v7  ;;  %v50_v13 = vand.u32 2147483647, %v40_v0  ;;  %v57_v14 = vadd.f32 1.0, %v56_v9  ;;  %s159_s7 = scalar_lea.vmem %s93_s6, 128  ;;  %p164_p3 = scmp.lt.s32.totalorder %s93_s6, %s93_s6 }
  0x2a   :  { %109 = vlog2.f32 %v53_v4  ;;  %v66_v15 = vadd.f32 1.0, %v65_v10  ;;  %v59_v16 = vand.u32 2147483647, %v41_v1  ;;  %v68_v17 = vand.u32 2147483647, %v42_v2  ;;  %p160_p2 = scmp.ne.s32.totalorder %s93_s6, %s159_s7  ;;  %p165_p4 = scmp.lt.s32.totalorder %s159_s7, %s159_s7 }
  0x2b   :  { %111 = vlog2.f32 %v62_v6  ;;  %v49_v18 = vmul.f32 %v48_v11, %v40_v0  ;;  %v75_v19 = vadd.f32 1.0, %v74_v12  ;;  %vm231_vm0 = vcmp.lt.f32.partialorder %v50_v13, 0.0004427343 }
  0x2c   :  { %113 = vlog2.f32 %v71_v8  ;;  %v77_v22 = vand.u32 2147483647, %v43_v5  ;;  %v58_v25 = vmul.f32 %v57_v14, %v41_v1  ;;  %v67_v26 = vmul.f32 %v66_v15, %v42_v2  ;;  %p166_p5 = por %p165_p4, %p164_p3 }
  0x2d   :  { %vm60_vm1 = vcmp.lt.f32.partialorder %v59_v16, 0.0004427343  ;;  %vm69_vm2 = vcmp.lt.f32.partialorder %v68_v17, 0.0004427343  ;;  %v76_v31 = vmul.f32 %v75_v19, %v43_v5 }
  0x2e   :  { %vm78_vm3 = vcmp.lt.f32.partialorder %v77_v22, 0.0004427343  ;;  %p167_p6 = pnand %p166_p5, %p160_p2 }
  0x33   :  { %v108_v20 = vpop.eup %107 }
  0x34   :  { %v110_v23 = vpop.eup %109  ;;  %v46_v24 = vmul.f32 0.6931472, %v108_v20 }
  0x35   :  { %v112_v27 = vpop.eup %111  ;;  %v55_v28 = vmul.f32 0.6931472, %v110_v23 }
  0x36   :  { %v52_v29 = vsel %vm231_vm0, %v49_v18, %v46_v24  ;;  %v64_v30 = vmul.f32 0.6931472, %v112_v27  ;;  %v114_v32 = vpop.eup %113 }
  0x37   :  { %v61_v33 = vsel %vm60_vm1, %v58_v25, %v55_v28  ;;  %v73_v35 = vmul.f32 0.6931472, %v114_v32 }
  0x38   :  { %v70_v34 = vsel %vm69_vm2, %v67_v26, %v64_v30 }
  0x39   :  { %v80_v36 = vsub.f32 %v52_v29, %v70_v34  ;;  %v79_v37 = vsel %vm78_vm3, %v76_v31, %v73_v35 }
  0x3a   :  { %v81_v38 = vsub.f32 %v61_v33, %v79_v37 }
  0x3b   :  { %v82_v39 = vmul.f32 %v80_v36, %v80_v36 }
  0x3c   :  { %v83_v40 = vmul.f32 %v81_v38, %v81_v38 }
  0x3e   :  { %v84_v41 = vadd.f32 %v83_v40, %v82_v39 }
  0x40   :  { %85 = vst [vmem:[#allocation7] sm:$0xff] %v84_v41 }
  0x41   :  { %170 = shalt.err (!%p167_p6)
}
  0x42   :  { %s171_s10 = scalar_lea.hbm %s251_s2, 128 }
  0x43   :  { %p172_p7 = scmp.ne.s32.totalorder %s251_s2, %s171_s10  ;;  %p175_p8 = scmp.lt.u32.totalorder %s171_s10, %s251_s2 }
  0x45   :  { %p177_p9 = pnand %p175_p8, %p172_p7 }
  0x47   :  { %180 = shalt.err (!%p177_p9)
}
  0x48   :  { %95 = dma.vmem_to_hbm [thread:$0]  %s93_s6, 128, %s251_s2, [#allocation4]  }
  0x49   :  { %185 = dma.done.wait [#allocation4], 128  }
  0x4a   :  { %186 = vsyncadd [#allocation4], 4294967168 }
  0x4b   :  { %99 = vsyncpa [#allocation3], 1 }
  0x4c   :  { %100 = vsyncpa [#allocation6], 1 }
  0x4d   :  { %101 = vsyncpa [#allocation4], 1 }

</bundles_post_ra>
